<compile_context>
chip_gen: v7x
topology: tpu7x:2x2x1
jax: 0.10.0
libtpu: 0.0.40
codegen_flags: <defaults>
</compile_context>

<pallas_src>
import jax
import jax.numpy as jnp
from jax import lax
from jax.experimental import pallas as pl
from jax.experimental.pallas import tpu as pltpu


def _round_up(x, m):
    return (x + m - 1) // m * m


# ----------------------------------------------------------------------------
# Pallas kernel: single-dot conv + folded-BN affine (+fused shortcut) (+relu)
# ----------------------------------------------------------------------------
def _make_kernel(relu: bool, shortcut_mode):
    """shortcut_mode: None | 'proj' (fused 1x1 conv+BN) | 'identity' (plain add)."""

    def kernel(*refs):
        if shortcut_mode == "proj":
            (taps_ref, w_ref, scale_ref, bias_ref,
             xs_ref, wsc_ref, ssc_ref, bsc_ref, out_ref) = refs
        elif shortcut_mode == "identity":
            taps_ref, w_ref, scale_ref, bias_ref, res_ref, out_ref = refs
        else:
            taps_ref, w_ref, scale_ref, bias_ref, out_ref = refs

        # One MXU matmul per tile: (tm, K*Cin) @ (K*Cin, tn) -> f32 accumulate.
        acc = jnp.dot(taps_ref[...], w_ref[...],
                      preferred_element_type=jnp.float32)
        y = acc * scale_ref[...] + bias_ref[...]          # folded BN (eval mode)

        if shortcut_mode == "proj":
            sc = jnp.dot(xs_ref[...], wsc_ref[...],
                         preferred_element_type=jnp.float32)
            y = y + (sc * ssc_ref[...] + bsc_ref[...])    # fused 1x1 conv + BN
        elif shortcut_mode == "identity":
            y = y + res_ref[...].astype(jnp.float32)

        if relu:
            y = jnp.maximum(y, 0.0)
        out_ref[...] = y.astype(out_ref.dtype)

    return kernel


def conv_bn_pallas(taps, w, scale, bias, *, shortcut=None, relu=False,
                   out_dtype=jnp.float32, tile_m_target=512, tile_n_target=256):
    """
    taps : (M, K*Cin) bf16     — im2col'd activations
    w    : (K*Cin, Cpad) bf16  — conv weight (output channels padded to 128n)
    scale/bias : (1, Cpad) f32 — folded BatchNorm affine
    shortcut   : None
               | ("proj", xs (M, Cin) bf16, wsc (Cin, Cpad) bf16,
                  ssc (1, Cpad) f32, bsc (1, Cpad) f32)
               | ("identity", res (M, Cpad))
    Returns (M, Cpad) out_dtype.
    """
    M, Kc = taps.shape
    Kc2, Cpad = w.shape
    assert Kc == Kc2 and Cpad % 128 == 0

    # ---- tile selection ----------------------------------------------------
    if M >= 2 * tile_m_target:
        tm = tile_m_target
    else:
        # keep >=2 M-steps (v7x has 2 TensorCores); tm multiple of 16 for bf16.
        tm = max(16, _round_up(M, 32) // 2)
    M_pad = _round_up(M, tm)
    tn = tile_n_target if Cpad % tile_n_target == 0 else 128

    pad_m = M_pad - M
    if pad_m:
        taps = jnp.pad(taps, ((0, pad_m), (0, 0)))

    mode = None if shortcut is None else shortcut[0]

    in_specs = [
        pl.BlockSpec((tm, Kc), lambda i, j: (i, 0)),
        pl.BlockSpec((Kc, tn), lambda i, j: (0, j)),
        pl.BlockSpec((1, tn), lambda i, j: (0, j)),
        pl.BlockSpec((1, tn), lambda i, j: (0, j)),
    ]
    args = [taps, w, scale, bias]

    if mode == "proj":
        _, xs, wsc, ssc, bsc = shortcut
        if pad_m:
            xs = jnp.pad(xs, ((0, pad_m), (0, 0)))
        Cin = xs.shape[1]
        in_specs += [
            pl.BlockSpec((tm, Cin), lambda i, j: (i, 0)),
            pl.BlockSpec((Cin, tn), lambda i, j: (0, j)),
            pl.BlockSpec((1, tn), lambda i, j: (0, j)),
            pl.BlockSpec((1, tn), lambda i, j: (0, j)),
        ]
        args += [xs, wsc, ssc, bsc]
    elif mode == "identity":
        _, res = shortcut
        if pad_m:
            res = jnp.pad(res, ((0, pad_m), (0, 0)))
        in_specs.append(pl.BlockSpec((tm, tn), lambda i, j: (i, j)))
        args.append(res)

    out = pl.pallas_call(
        _make_kernel(relu, mode),
        out_shape=jax.ShapeDtypeStruct((M_pad, Cpad), out_dtype),
        grid=(M_pad // tm, Cpad // tn),
        in_specs=in_specs,
        out_specs=pl.BlockSpec((tm, tn), lambda i, j: (i, j)),
        compiler_params=pltpu.CompilerParams(
            dimension_semantics=("parallel", "parallel")),
    )(*args)
    return out[:M] if pad_m else out


# ----------------------------------------------------------------------------
# Glue: im2col (padding + strided tap extraction) in plain JAX
# ----------------------------------------------------------------------------
def im2col_3x3(x_nhwc, stride):
    """Returns taps (N*Ho*Wo, 9*C) with layout (tap-major, channel-minor)."""
    N, H, W, C = x_nhwc.shape
    Ho = (H + 2 - 3) // stride + 1
    Wo = (W + 2 - 3) // stride + 1
    xp = jnp.pad(x_nhwc, ((0, 0), (1, 1), (1, 1), (0, 0)))
    taps = []
    for dy in range(3):
        for dx in range(3):
            t = xp[:, dy: dy + stride * (Ho - 1) + 1: stride,
                   dx: dx + stride * (Wo - 1) + 1: stride, :]
            taps.append(t.reshape(N * Ho * Wo, C))
    return jnp.concatenate(taps, axis=-1), (N, Ho, Wo)


def fold_bn(gamma, beta, mean, var, eps=1e-5):
    scale = gamma / jnp.sqrt(var + eps)
    bias = beta - mean * scale
    return scale, bias


def prepare_params(w1_hwio, w2_hwio, wsc_hwio, bn1, bn2, bnsc, eps=1e-5):
    """Fold BN, pad output channels to a multiple of 128, pack for the kernel."""
    Cin = w1_hwio.shape[2]
    Cout = w1_hwio.shape[3]
    Cpad = _round_up(Cout, 128)
    dpad = Cpad - Cout

    def pad_vec(v):
        return jnp.pad(v, (0, dpad)).reshape(1, Cpad).astype(jnp.float32)

    s1, b1 = fold_bn(*bn1, eps=eps)
    s2, b2 = fold_bn(*bn2, eps=eps)

    params = {
        "cout": Cout, "cpad": Cpad,
        "w1": jnp.pad(w1_hwio, ((0, 0), (0, 0), (0, 0), (0, dpad)))
              .reshape(9 * Cin, Cpad).astype(jnp.bfloat16),
        "scale1": pad_vec(s1), "bias1": pad_vec(b1),
        # conv2 input channels come from the (padded) conv1 output -> pad both.
        "w2": jnp.pad(w2_hwio, ((0, 0), (0, 0), (0, dpad), (0, dpad)))
              .reshape(9 * Cpad, Cpad).astype(jnp.bfloat16),
        "scale2": pad_vec(s2), "bias2": pad_vec(b2),
    }
    if wsc_hwio is not None:
        ssc, bsc = fold_bn(*bnsc, eps=eps)
        params["wsc"] = jnp.pad(wsc_hwio, ((0, 0), (0, 0), (0, 0), (0, dpad))) \
                           .reshape(Cin, Cpad).astype(jnp.bfloat16)
        params["scale_sc"] = pad_vec(ssc)
        params["bias_sc"] = pad_vec(bsc)
    return params


# ----------------------------------------------------------------------------
# BasicBlock forward (Pallas)
# ----------------------------------------------------------------------------
def basic_block_forward(x_nchw, params, stride):
    x = jnp.transpose(x_nchw, (0, 2, 3, 1))            # NCHW -> NHWC
    N, H, W, Cin = x.shape
    Cout, Cpad = params["cout"], params["cpad"]
    x_bf = x.astype(jnp.bfloat16)

    # conv1 (3x3, stride) + bn1 + relu  -> bf16, channels padded to Cpad
    taps1, (N, Ho, Wo) = im2col_3x3(x_bf, stride)
    out1 = conv_bn_pallas(taps1, params["w1"], params["scale1"], params["bias1"],
                          relu=True, out_dtype=jnp.bfloat16)

    # conv2 (3x3, stride 1) + bn2 + shortcut + relu, all fused in one kernel
    taps2, _ = im2col_3x3(out1.reshape(N, Ho, Wo, Cpad), 1)
    if stride != 1 or Cin != Cout:
        x_s = x_bf[:, ::stride, ::stride, :][:, :Ho, :Wo, :].reshape(
            N * Ho * Wo, Cin)
        shortcut = ("proj", x_s, params["wsc"],
                    params["scale_sc"], params["bias_sc"])
    else:
        res = jnp.pad(x_bf.reshape(N * Ho * Wo, Cin), ((0, 0), (0, Cpad - Cin)))
        shortcut = ("identity", res)

    out2 = conv_bn_pallas(taps2, params["w2"], params["scale2"], params["bias2"],
                          shortcut=shortcut, relu=True, out_dtype=jnp.float32)

    out = out2[:, :Cout].reshape(N, Ho, Wo, Cout)
    return jnp.transpose(out, (0, 3, 1, 2))            # NHWC -> NCHW


# ----------------------------------------------------------------------------
# Pure-JAX reference (mirrors the kernel's bf16 quantization points)
# ----------------------------------------------------------------------------
def reference_forward(x_nchw, raw, stride, eps=1e-5):
    q = lambda a: a.astype(jnp.bfloat16).astype(jnp.float32)
    x = q(jnp.transpose(x_nchw, (0, 2, 3, 1)))

    def conv(inp, w_hwio, s, pad):
        return lax.conv_general_dilated(
            inp, q(w_hwio), (s, s), [(pad, pad), (pad, pad)],
            dimension_numbers=("NHWC", "HWIO", "NHWC"))

    def bn(y, stats):
        g, b, m, v = stats
        return (y - m) / jnp.sqrt(v + eps) * g + b

    out = jax.nn.relu(bn(conv(x, raw["w1"], stride, 1), raw["bn1"]))
    out = q(out)                                        # bf16 intermediate
    out = bn(conv(out, raw["w2"], 1, 1), raw["bn2"])
    if raw.get("wsc") is not None:
        sc = bn(conv(x, raw["wsc"], stride, 0), raw["bnsc"])
    else:
        sc = x
    out = jax.nn.relu(out + sc)
    return jnp.transpose(out, (0, 3, 1, 2))


# ----------------------------------------------------------------------------
if __name__ == "__main__":
    key = jax.random.PRNGKey(0)

    def bn_init(k, c):
        k1, k2, k3, k4 = jax.random.split(k, 4)
        gamma = jax.random.uniform(k1, (c,), minval=0.5, maxval=1.5)
        beta = jax.random.normal(k2, (c,)) * 0.1
        mean = jax.random.normal(k3, (c,)) * 0.1
        var = jax.random.uniform(k4, (c,), minval=0.5, maxval=1.5)
        return gamma, beta, mean, var

    def run_case(key, N, Cin, H, W, Cout, stride):
        keys = jax.random.split(key, 8)
        x = jax.random.normal(keys[0], (N, Cin, H, W), dtype=jnp.float32)
        w1 = jax.random.normal(keys[1], (3, 3, Cin, Cout)) * 0.2
        w2 = jax.random.normal(keys[2], (3, 3, Cout, Cout)) * 0.2
        bn1, bn2 = bn_init(keys[4], Cout), bn_init(keys[5], Cout)
        has_proj = (stride != 1 or Cin != Cout)
        wsc = jax.random.normal(keys[3], (1, 1, Cin, Cout)) * 0.2 if has_proj else None
        bnsc = bn_init(keys[6], Cout) if has_proj else None

        params = prepare_params(w1, w2, wsc, bn1, bn2, bnsc)
        raw = {"w1": w1, "w2": w2, "wsc": wsc,
               "bn1": bn1, "bn2": bn2, "bnsc": bnsc}

        out = jax.block_until_ready(basic_block_forward(x, params, stride))
        ref = jax.block_until_ready(reference_forward(x, raw, stride))

        Ho = (H + 2 - 3) // stride + 1
        assert out.shape == (N, Cout, Ho, Ho), out.shape
        if not jnp.allclose(out, ref, rtol=1e-2, atol=1e-2):
            err = jnp.max(jnp.abs(out - ref))
            raise AssertionError(f"Pallas BasicBlock mismatch (max abs err {err})")

    # Case 1: projection shortcut (stride=2, channel change) — as in ResNet.
    run_case(jax.random.PRNGKey(0), N=2, Cin=4, H=16, W=16, Cout=8, stride=2)
    # Case 2: identity shortcut (stride=1, same channels).
    run_case(jax.random.PRNGKey(1), N=2, Cin=8, H=16, W=16, Cout=8, stride=1)

    print("KERNEL_OK")
</pallas_src>

<mosaic_0001>
module attributes {stable_mosaic.version = 11 : i64} {
  func.func @kernel(%arg0: i32, %arg1: i32, %arg2: memref<64x36xbf16, #tpu.memory_space<vmem>>, %arg3: memref<36x128xbf16, #tpu.memory_space<vmem>>, %arg4: memref<1x128xf32, #tpu.memory_space<vmem>>, %arg5: memref<1x128xf32, #tpu.memory_space<vmem>>, %arg6: memref<64x128xbf16, #tpu.memory_space<vmem>>) attributes {dimension_semantics = [#tpu.dimension_semantics<parallel>, #tpu.dimension_semantics<parallel>], iteration_bounds = array<i64: 2, 1>, scalar_prefetch = 0 : i64, scratch_operands = 0 : i64, tpu.core_type = #tpu.core_type<tc>, window_params = [{transform_indices = @transform_0, window_bounds = array<i64: 64, 36>}, {transform_indices = @transform_1, window_bounds = array<i64: 36, 128>}, {transform_indices = @transform_2, window_bounds = array<i64: 1, 128>}, {transform_indices = @transform_3, window_bounds = array<i64: 1, 128>}, {transform_indices = @transform_4, window_bounds = array<i64: 64, 128>}]} {
    %c0 = arith.constant 0 : index
    %c0_0 = arith.constant 0 : index
    %0 = vector.load %arg2[%c0, %c0_0] : memref<64x36xbf16, #tpu.memory_space<vmem>>, vector<64x36xbf16>
    %c0_1 = arith.constant 0 : index
    %c0_2 = arith.constant 0 : index
    %1 = vector.load %arg3[%c0_1, %c0_2] : memref<36x128xbf16, #tpu.memory_space<vmem>>, vector<36x128xbf16>
    %cst = arith.constant dense<0.000000e+00> : vector<64x128xf32>
    %2 = tpu.matmul %0, %1, %cst {dimension_numbers = #tpu.dot_dimension_numbers<[1], [0], [0], [1], [0, 0, 1, 1], [], []>} : vector<64x36xbf16>, vector<36x128xbf16>, vector<64x128xf32> -> vector<64x128xf32>
    %c0_3 = arith.constant 0 : index
    %c0_4 = arith.constant 0 : index
    %3 = vector.load %arg4[%c0_3, %c0_4] : memref<1x128xf32, #tpu.memory_space<vmem>>, vector<1x128xf32>
    %4 = vector.broadcast %3 : vector<1x128xf32> to vector<64x128xf32>
    %5 = arith.mulf %2, %4 : vector<64x128xf32>
    %c0_5 = arith.constant 0 : index
    %c0_6 = arith.constant 0 : index
    %6 = vector.load %arg5[%c0_5, %c0_6] : memref<1x128xf32, #tpu.memory_space<vmem>>, vector<1x128xf32>
    %7 = vector.broadcast %6 : vector<1x128xf32> to vector<64x128xf32>
    %8 = arith.addf %5, %7 : vector<64x128xf32>
    %cst_7 = arith.constant 0.000000e+00 : f32
    %9 = vector.broadcast %cst_7 : f32 to vector<64x128xf32>
    %10 = arith.maximumf %8, %9 : vector<64x128xf32>
    %11 = arith.truncf %10 : vector<64x128xf32> to vector<64x128xbf16>
    %c0_8 = arith.constant 0 : index
    %c0_9 = arith.constant 0 : index
    %12 = vector.load %arg6[%c0_8, %c0_9] : memref<64x128xbf16, #tpu.memory_space<vmem>>, vector<64x128xbf16>
    tpu.vector_store %arg6[%c0_8, %c0_9], %11 {strides = array<i32>} : memref<64x128xbf16, #tpu.memory_space<vmem>>, vector<64x128xbf16>,
    return
  }
  func.func @transform_0(%arg0: i32, %arg1: i32) -> (i32, i32) {
    %c0_i32 = arith.constant 0 : i32
    %c0_i32_0 = arith.constant 0 : i32
    return %arg0, %c0_i32 : i32, i32
  }
  func.func @transform_1(%arg0: i32, %arg1: i32) -> (i32, i32) {
    %c0_i32 = arith.constant 0 : i32
    %c0_i32_0 = arith.constant 0 : i32
    return %c0_i32, %arg1 : i32, i32
  }
  func.func @transform_2(%arg0: i32, %arg1: i32) -> (i32, i32) {
    %c0_i32 = arith.constant 0 : i32
    %c0_i32_0 = arith.constant 0 : i32
    return %c0_i32, %arg1 : i32, i32
  }
  func.func @transform_3(%arg0: i32, %arg1: i32) -> (i32, i32) {
    %c0_i32 = arith.constant 0 : i32
    %c0_i32_0 = arith.constant 0 : i32
    return %c0_i32, %arg1 : i32, i32
  }
  func.func @transform_4(%arg0: i32, %arg1: i32) -> (i32, i32) {
    %c0_i32 = arith.constant 0 : i32
    return %arg0, %arg1 : i32, i32
  }
}

</mosaic_0001>

<bundles_post_ra>
// kernel: tpu_custom_call.1
= control target key start
LH: loop header
LB: loop body
LE: loop exit
PB: predicated region body
PF: predicated region fallthrough
CT: control target
= control target key end

     0   :  { %9 = vsyncpa [#allocation3], 0  ;;  %s996_s0 = inlined_call_operand.vmem [shape: bf16[128,36], index: 0, kind: input, shape index: {}]   ;;  %s997_s1 = inlined_call_operand.vmem [shape: bf16[36,128], index: 1, kind: input, shape index: {}]   ;;  %s998_s2 = inlined_call_operand.vmem [shape: f32[1,128], index: 2, kind: input, shape index: {}]   ;;  %s999_s3 = inlined_call_operand.vmem [shape: f32[1,128], index: 3, kind: input, shape index: {}]   ;;  %s1000_s4 = inlined_call_operand.hbm [shape: bf16[128,128], index: 4, kind: output, shape index: {}]  }
   0x1   :  { %11 = vsyncpa [#allocation3 + $0x1], 0  ;;  %s863_s15 = smov 0   ;;  %s865_s16 = smov 0  }
   0x2   :  { %s867_s17 = smov 0   ;;  %s869_s18 = smov 0  }
   0x3   :  { %s871_s19 = smov 0   ;;  %s873_s20 = smov 0  }
   0x4 LB: > { %s593_s21 = sadd.s32 4294967295, %s833_s20   ;;  %s594_s22 = sadd.s32 4294967294, %s833_s20   ;;  %s833_s20 = sphi %s873_s20, %s17_s20   ;;  %s829_s19 = sphi %s871_s19, %s1007_s19   ;;  %s825_s18 = sphi %s869_s18, %s1006_s18   ;;  %s821_s17 = sphi %s867_s17, %s1005_s17   ;;  %s817_s16 = sphi %s865_s16, %s1004_s16   ;;  %s813_s15 = sphi %s863_s15, %s1003_s15  }
   0x5   : > { %s29_s23 = sadd.s32 1, %s829_s19  ;;  %s142_s24 = sadd.s32 1, %s821_s17 }
   0x6   : > { %p31_p0 = scmp.ge.s32.totalorder %s29_s23, 2  ;;  %p152_p1 = scmp.ne.s32.totalorder %s821_s17, %s817_s16 }
   0x7   : > { %p153_p2 = scmp.eq.s32.totalorder %s593_s21, 1  ;;  %p158_p3 = scmp.ne.s32.totalorder %s817_s16, %s813_s15 }
   0x8   : > { %s1009_s23 = smov (%p31_p0, %s29_s23), 0  ;;  %p159_p5 = scmp.eq.s32.totalorder %s594_s22, 1 }
   0x9   : > { %p903_p4 = por %p153_p2, %p152_p1  ;;  %s137_s26 = ssub.s32 %s829_s19, %s1009_s23 }
   0xa   : > { %p600_p6 = scmp.ge.s32.totalorder %s833_s20, 1  ;;  %p140_p7 = scmp.eq.s32.totalorder %s137_s26, 0 }
   0xb   : > { %p910_p8 = por %p159_p5, %p158_p3  ;;  %p205_p9 = scmp.lt.s32.totalorder %s833_s20, 3 }
   0xc   : > { %s916_s28 = scalar_select %p140_p7, %s821_s17, %s142_s24  }
   0xd   : > { %p206_p10 = pnand %p600_p6, %p205_p9 }
   0xe   : > { %v748_v0 = vld [vmem:[%s997_s1] sm:$0xff] (!%p206_p10)   ;;  %v749_v1 = vld [vmem:[%s997_s1 + $0x8] sm:$0xff] (!%p206_p10)   ;;  %s602_s7 = sshll.u32 (!%p206_p10), %s825_s18, 3  ;;  %v750_v2 = vld [vmem:[%s997_s1 + $0x10] ss:$0 sps:$4 sm:$0x33] (!%p206_p10)  }
   0xf   : > { %209 = sbr.rel (%p206_p10) target bundleno = 265 (0x109), region = 36  ;;  %669 = vmatprep.subr.bf16.mxu0 (!%p206_p10), %v748_v0  ;;  %683 = vmatprep.subr.bf16.mxu1 (!%p206_p10), %v748_v0  ;;  %p242_p11 = scmp.lt.s32.totalorder (!%p206_p10), %s602_s7, 15  ;;  %vm320_vm0 = vcmask (!%p206_p10), 1041408   ;;  %vm307_vm1 = vcmask (!%p206_p10), 293888   ;;  %v615_v8 = vld [vmem:[%s998_s2] ss:$0 sm:$0xff] (!%p206_p10) }
  0x10   : > { %670 = vmatpush3.bf16.msra.mxu0 (!%p206_p10), %v748_v0  ;;  %686 = vmatpush3.bf16.msra.mxu1 (!%p206_p10), %v748_v0  ;;  %v322_v3 = vsel (!%p206_p10), %vm320_vm0, %v750_v2, 0  ;;  %s238_s14 = sand.u32 (!%p206_p10), 1, %s817_s16   ;;  %v616_v10 = vld [vmem:[%s999_s3] ss:$0 sm:$0xff] (!%p206_p10)  ;;  %s638_s6 = sshll.u32 (!%p206_p10), %s825_s18, 9 }
  0x11   : > { %671 = vmatprep.subr.bf16.mxu0 (!%p206_p10), %v749_v1  ;;  %684 = vmatprep.subr.bf16.mxu1 (!%p206_p10), %v749_v1  ;;  %s601_s29 = sshll.u32 (!%p206_p10), %s238_s14, 5  ;;  %s944_s9 = scalar_lea.hbm (!%p206_p10), %s1000_s4, %s638_s6 }
  0x12   : > { %s240_s30 = scalar_lea.vmem (!%p206_p10), [#allocation2], %s601_s29  ;;  %s950_s18 = scalar_lea.sflag (!%p206_p10), [#allocation3], %s238_s14 }
  0x13   : > { %s482_s5 = sshll.u32 (!%p206_p10), %s240_s30, 4  ;;  %s835_s11 = smov (!%p206_p10), [#allocation2]   ;;  %s946_s5 = int_to_ptr.vmem [resolvable:$true] %s482_s5 }
  0x14   : > { %672 = vmatpush3.bf16.msra.mxu0 (!%p206_p10), %v749_v1  ;;  %687 = vmatpush3.bf16.msra.mxu1 (!%p206_p10), %v749_v1  ;;  %s759_s12 = sshll.u32 (!%p206_p10), %s835_s11, 4  ;;  %s760_s12 = int_to_ptr.vmem [resolvable:$false] %s759_s12 }
  0x15   : > { %689 = vmatprep.subr.msk.bf16.mxu0 (!%p206_p10), %vm320_vm0, %v750_v2  ;;  %690 = vmatprep.subr.msk.bf16.mxu1 (!%p206_p10), %vm320_vm0, %v750_v2  ;;  %p762_p1 = scmp.lt.s32.totalorder (!%p206_p10), %s946_s5, %s760_s12 }
  0x16   : > { %s1011_s7 = smov (!%p242_p11, %s602_s7), 15 }
  0x17   : > { %s603_s10 = sshll.u32 %s1011_s7, 2 }
  0x18   : > { %s245_s13 = scalar_lea.vmem %s996_s0, %s603_s10  ;;  %674 = vmatpush3.bf16.msra.mxu0 %v322_v3  ;;  %688 = vmatpush3.bf16.msra.mxu1 %v322_v3  ;;  %s755_s10 = scalar_lea.vmem %s946_s5, 512 }
  0x19   : > { %v751_v4 = vld [vmem:[%s245_s13] sm:$0xff]   ;;  %v752_v5 = vld [vmem:[%s245_s13 + $0x10] sm:$0xff]   ;;  %v753_v6 = vld [vmem:[%s245_s13 + $0x8] sm:$0xff]   ;;  %p756_p12 = scmp.ne.s32.totalorder %s946_s5, %s755_s10 }
  0x1a   : > { %675 = vmatprep.mubr.msk.bf16.mxu0 %vm307_vm1, %v751_v4  ;;  %v754_v7 = vld [vmem:[%s245_s13 + $0x18] sm:$0xff]   ;;  %679 = vmatprep.mubr.msk.bf16.mxu1 %vm307_vm1, %v752_v5  ;;  %s761_s13 = scalar_lea.vmem %s760_s12, 1024 }
  0x1b   : > { %676 = vmatmul.mubr.msk.bf16.vlgmr.msra.gmra.mrb[0].mxu0 %vm307_vm1, %v753_v6  ;;  %680 = vmatmul.mubr.msk.bf16.vlgmr.msra.gmra.mrb[0].mxu1 %vm307_vm1, %v754_v7  ;;  %p757_p13 = pnand %p756_p12, %p903_p4  ;;  %p763_p2 = scmp.lt.s32.totalorder %s761_s13, %s755_s10 }
  0x1d   : > { %p758_p0 = pneg %p757_p13  ;;  %p764_p3 = por %p763_p2, %p762_p1 }
  0x1f   : > { %p765_p5 = pnand %p764_p3, %p758_p0 }
  0xee   : > { %v677_v9 = vpop.f32.mrb[0].mxu0  ;;  %v681_v11 = vpop.f32.mrb[0].mxu1 }
  0xef   : > { %v398_v12 = vmul.f32 %v677_v9, %v615_v8  ;;  %v402_v13 = vmul.f32 %v681_v11, %v615_v8  ;;  %v358_v14 = vpop.f32.mrb[1].mxu0  ;;  %v374_v15 = vpop.f32.mrb[1].mxu1 }
  0xf0   : > { %v396_v16 = vmul.f32 %v615_v8, %v358_v14  ;;  %v400_v17 = vmul.f32 %v615_v8, %v374_v15  ;;  %v678_v18 = vpop.f32.mrb[2].mxu0  ;;  %v682_v19 = vpop.f32.mrb[2].mxu1 }
  0xf1   : > { %v413_v20 = vadd.f32 %v616_v10, %v398_v12  ;;  %v417_v21 = vadd.f32 %v616_v10, %v402_v13  ;;  %v399_v22 = vmul.f32 %v678_v18, %v615_v8  ;;  %v403_v23 = vmul.f32 %v682_v19, %v615_v8  ;;  %v361_v24 = vpop.f32.mrb[3].mxu0  ;;  %v377_v25 = vpop.f32.mrb[3].mxu1 }
  0xf2   : > { %v411_v26 = vadd.f32 %v616_v10, %v396_v16  ;;  %v415_v27 = vadd.f32 %v616_v10, %v400_v17  ;;  %v397_v28 = vmul.f32 %v615_v8, %v361_v24  ;;  %v401_v29 = vmul.f32 %v615_v8, %v377_v25 }
  0xf3   : > { %v414_v30 = vadd.f32 %v616_v10, %v399_v22  ;;  %v418_v31 = vadd.f32 %v616_v10, %v403_v23  ;;  %v421_v34 = vmax.f32 %v413_v20, 0.0  ;;  %v425_v35 = vmax.f32 %v417_v21, 0.0 }
  0xf4   : > { %v412_v32 = vadd.f32 %v616_v10, %v397_v28  ;;  %v416_v33 = vadd.f32 %v616_v10, %v401_v29  ;;  %v419_v38 = vmax.f32 %v411_v26, 0.0  ;;  %v423_v39 = vmax.f32 %v415_v27, 0.0 }
  0xf5   : > { %v422_v36 = vmax.f32 %v414_v30, 0.0  ;;  %v426_v37 = vmax.f32 %v418_v31, 0.0 }
  0xf6   : > { %v420_v40 = vmax.f32 %v412_v32, 0.0  ;;  %v424_v41 = vmax.f32 %v416_v33, 0.0 }
  0xf7   : > { %v647_v42 = vpack.c.bf16 %v422_v36, %v421_v34  ;;  %v657_v43 = vpack.c.bf16 %v426_v37, %v425_v35 }
  0xf8   : > { %v642_v44 = vpack.c.bf16 %v420_v40, %v419_v38  ;;  %v652_v45 = vpack.c.bf16 %v424_v41, %v423_v39 }
  0xf9   : > { %659 = vst [vmem:[%s240_s30 + $0x8] sm:$0xff] %v647_v42   ;;  %661 = vst [vmem:[%s240_s30 + $0x18] sm:$0xff] %v657_v43  }
  0xfa   : > { %643 = vst [vmem:[%s240_s30] sm:$0xff] %v642_v44   ;;  %660 = vst [vmem:[%s240_s30 + $0x10] sm:$0xff] %v652_v45  }
  0xfb   : > { %768 = shalt.err (!%p765_p5)
}
  0xfc   : > { %s769_s14 = scalar_lea.hbm %s944_s9, 512  ;;  %s773_s24 = scalar_lea.hbm %s1000_s4, 1024 }
  0xfd   : > { %p770_p6 = scmp.ne.s32.totalorder %s944_s9, %s769_s14  ;;  %p774_p10 = scmp.lt.u32.totalorder %s944_s9, %s1000_s4 }
  0xfe   : > { %p775_p11 = scmp.lt.u32.totalorder %s773_s24, %s769_s14  ;;  %p777_p13 = scmp.lt.u32.totalorder %s769_s14, %s944_s9 }
  0xff   : > { %p771_p7 = pnand %p770_p6, %p903_p4 }
 0x100   : > { %p776_p12 = por %p775_p11, %p774_p10 }
 0x101   : > { %p772_p9 = pneg %p771_p7 }
 0x102   : > { %p778_p0 = por %p777_p13, %p776_p12 }
 0x104   : > { %p779_p1 = pnand %p778_p0, %p772_p9 }
 0x106   : > { %782 = shalt.err (!%p779_p1)
}
 0x107   : > { %s836_s30 = smov 64   ;;  %s837_s6 = smov 4  }
 0x108   : > { %691 = dma.vmem_to_hbm [thread:$0]  (%p903_p4), %s946_s5, 512, %s944_s9, %s950_s18, %s836_s30, %s836_s30, %s837_s6  }
 0x109 PF: > { %p697_p2 = scmp.ge.s32.totalorder %s833_s20, 2  ;;  %s497_s7 = sand.u32 1, %s813_s15  }
 0x10a   : > { %s498_s8 = scalar_lea.sflag [#allocation3], %s497_s7 }
 0x10b   : > { %p694_p3 = pnand %p697_p2, %p910_p8 }
 0x10d   : > { %808 = dma.done.wait (!%p694_p3), %s498_s8, 512  }
 0x10e   : > { %810 = vsyncadd (!%p694_p3), %s498_s8, 4294966784  ;;  %s17_s20 = sadd.s32 1, %s833_s20   ;;  %s1003_s15 = smov %s817_s16 }
 0x10f   : > { %p14_p5 = scmp.ge.s32.totalorder %s17_s20, 4   ;;  %s1004_s16 = smov %s821_s17 }
 0x110   : > { %s1005_s17 = smov %s916_s28  ;;  %s1006_s18 = smov %s829_s19 }
 0x111   : > { %s1007_s19 = smov %s1009_s23  ;;  %16 = sbr.rel (!%p14_p5) target bundleno = 4 (0x4), region = 80 }
 0x118   :  { %503 = vsyncpa [#allocation3], 1 }
 0x119   :  { %505 = vsyncpa [#allocation3 + $0x1], 1 }

</bundles_post_ra>
